<compile_context>
chip_gen: v5e
topology: v5e:2x2
jax: 0.10.0
libtpu: 0.0.40
codegen_flags: <defaults>
</compile_context>

<pallas_src>
import functools
from typing import NamedTuple

import jax
import jax.numpy as jnp
import numpy as np
from jax import lax
from jax.experimental import pallas as pl
from jax.experimental.pallas import tpu as pltpu


# ----------------------------------------------------------------------------
# Kernels
# ----------------------------------------------------------------------------
def _encoder_kernel(x_ref, w1_ref, b1_ref, w2_ref, b2_ref, w3_ref, b3_ref,
                    mu_ref, lv_ref, d1_ref, acc_ref, ssq_ref):
    """Fused: L2-normalize + Linear1 + tanh + Linear2(mu/logvar) + Linear3 + tanh.

    Grid = (batch_tiles, k_tiles) with k (n_items reduction) last / "arbitrary".
    acc_ref : (tm, Hp) f32 accumulator for x @ W1t (un-normalized).
    ssq_ref : (tm, 1)  f32 accumulator for row sum-of-squares (for the normalize).
    Outputs mu / logvar (f32) and d1 = tanh(mu @ W3t + b3) (compute dtype).
    """
    k = pl.program_id(1)

    @pl.when(k == 0)
    def _():
        acc_ref[...] = jnp.zeros_like(acc_ref)
        ssq_ref[...] = jnp.zeros_like(ssq_ref)

    x = x_ref[...]
    xf = x.astype(jnp.float32)
    ssq_ref[...] += jnp.sum(xf * xf, axis=-1, keepdims=True)
    acc_ref[...] += jnp.dot(x, w1_ref[...], preferred_element_type=jnp.float32)

    @pl.when(k == pl.num_programs(1) - 1)
    def _():
        # F.normalize: x / max(||x||, 1e-12)  ==  x * rsqrt(max(||x||^2, 1e-24))
        inv = lax.rsqrt(jnp.maximum(ssq_ref[...], 1e-24))
        h1 = jnp.tanh(acc_ref[...] * inv + b1_ref[...].astype(jnp.float32))
        h1c = h1.astype(w2_ref.dtype)
        # Single fused (Hp, 2*Lp) matmul for [mu | logvar].
        h2 = jnp.dot(h1c, w2_ref[...], preferred_element_type=jnp.float32) \
            + b2_ref[...].astype(jnp.float32)
        Lp = mu_ref.shape[-1]
        mu = h2[:, :Lp]
        lv = h2[:, Lp:]
        mu_ref[...] = mu.astype(mu_ref.dtype)
        lv_ref[...] = lv.astype(lv_ref.dtype)
        # Eval mode: z = mu.  Decoder hidden is computed here so the decoder
        # pallas_call is a pure streamed GEMM (both grid axes parallel).
        d1 = jnp.tanh(jnp.dot(mu.astype(w3_ref.dtype), w3_ref[...],
                              preferred_element_type=jnp.float32)
                      + b3_ref[...].astype(jnp.float32))
        d1_ref[...] = d1.astype(d1_ref.dtype)


def _decoder_kernel(d1_ref, w4_ref, b4_ref, out_ref):
    """Pure streamed GEMM: out = d1 @ W4t + b4.  Grid = (batch_tiles, n_tiles),
    every step independent -> both axes "parallel" (megacore-friendly)."""
    out = jnp.dot(d1_ref[...], w4_ref[...], preferred_element_type=jnp.float32) \
        + b4_ref[...].astype(jnp.float32)
    out_ref[...] = out.astype(out_ref.dtype)


# ----------------------------------------------------------------------------
# Wrapper
# ----------------------------------------------------------------------------
def _round_up(x, m):
    return ((x + m - 1) // m) * m


def _pad2d(a, rows, cols):
    r, c = a.shape
    return jnp.pad(a, ((0, rows - r), (0, cols - c)))


class PreparedVAEParams(NamedTuple):
    w1_t: jax.Array   # (Nk, Hp)    encoder_input_layer.weight.T, padded, compute dtype
    b1:   jax.Array   # (1, Hp)     f32
    w2_t: jax.Array   # (Hp, 2*Lp)  [W2_mu.T | W2_logvar.T], compute dtype
    b2:   jax.Array   # (1, 2*Lp)   f32
    w3_t: jax.Array   # (Lp, Hp)    compute dtype
    b3:   jax.Array   # (1, Hp)     f32
    w4_t: jax.Array   # (Hp, Nn)    compute dtype
    b4:   jax.Array   # (1, Nn)     f32


def prepare_vae_params(params, *, compute_dtype=jnp.bfloat16, tk=1024, tn=1024):
    """One-time weight layout: transpose to (in, out), zero-pad lane dims to
    multiples of 128 and the n_items axes to the streamed tile sizes, cast to
    the MXU compute dtype.  Hoisted out of the per-call hot path.

    PyTorch-layout params:
       w1:(H,N) b1:(H,)  w2:(2L,H) b2:(2L,)  w3:(H,L) b3:(H,)  w4:(N,H) b4:(N,)
    """
    w1, b1 = params["w1"], params["b1"]
    w2, b2 = params["w2"], params["b2"]
    w3, b3 = params["w3"], params["b3"]
    w4, b4 = params["w4"], params["b4"]

    H, N = w1.shape
    L = w3.shape[1]
    assert w2.shape == (2 * L, H) and w4.shape == (N, H)

    Hp = _round_up(H, 128)
    Lp = _round_up(L, 128)
    tk = _round_up(min(tk, _round_up(N, 128)), 128)
    tn = _round_up(min(tn, _round_up(N, 128)), 128)
    Nk = _round_up(N, tk)
    Nn = _round_up(N, tn)

    f32 = jnp.float32
    cdt = compute_dtype

    w1_t = _pad2d(w1.T, Nk, Hp).astype(cdt)
    b1_p = _pad2d(b1.reshape(1, H).astype(f32), 1, Hp)
    # Concatenate the mu / logvar halves of W2 -> single resident weight.
    w2_t = jnp.concatenate(
        [_pad2d(w2[:L, :].T, Hp, Lp), _pad2d(w2[L:, :].T, Hp, Lp)],
        axis=1).astype(cdt)
    b2_p = jnp.concatenate(
        [_pad2d(b2[:L].reshape(1, L).astype(f32), 1, Lp),
         _pad2d(b2[L:].reshape(1, L).astype(f32), 1, Lp)], axis=1)
    w3_t = _pad2d(w3.T, Lp, Hp).astype(cdt)
    b3_p = _pad2d(b3.reshape(1, H).astype(f32), 1, Hp)
    w4_t = _pad2d(w4.T, Hp, Nn).astype(cdt)
    b4_p = _pad2d(b4.reshape(1, N).astype(f32), 1, Nn)

    return PreparedVAEParams(w1_t, b1_p, w2_t, b2_p, w3_t, b3_p, w4_t, b4_p)


def vae_forward_pallas(x, prep: PreparedVAEParams, *, n_items, n_latent,
                       out_dtype=jnp.float32, tm=256, tk=1024, tn=1024,
                       interpret=False):
    """Eval-mode Multi-VAE forward.  Returns (out, mu, logvar);
    mu/logvar are float32, out is `out_dtype` (float32 default; bf16 halves the
    decoder writeback if downstream ranking tolerates it)."""
    N, L = n_items, n_latent
    Nk, Hp = prep.w1_t.shape
    Lp = prep.w3_t.shape[0]
    Nn = prep.w4_t.shape[1]
    B = x.shape[0]
    assert x.shape[1] == N
    cdt = prep.w1_t.dtype

    # Tile sizes (clamped for tiny shapes; must match prepare_vae_params padding).
    tm = _round_up(min(tm, _round_up(B, 8)), 8)
    Bp = _round_up(B, tm)
    tk = _round_up(min(tk, _round_up(N, 128)), 128)
    tn = _round_up(min(tn, _round_up(N, 128)), 128)
    assert Nk % tk == 0 and Nn % tn == 0, "tk/tn must match prepare_vae_params()"

    f32 = jnp.float32
    vmem_cap = 32 * 1024 * 1024  # fits every generation; > v5e's 16 MiB default

    # Single staging pass: cast to compute dtype, then pad.
    xp = _pad2d(x.astype(cdt), Bp, Nk)

    # ---- encoder: normalize + L1 + tanh + L2(mu|logvar) + L3 + tanh, fused -----
    mu_p, lv_p, d1_p = pl.pallas_call(
        _encoder_kernel,
        grid=(Bp // tm, Nk // tk),
        in_specs=[
            pl.BlockSpec((tm, tk), lambda i, k: (i, k)),       # x tile     (streamed)
            pl.BlockSpec((tk, Hp), lambda i, k: (k, 0)),       # W1 tile    (streamed)
            pl.BlockSpec((1, Hp), lambda i, k: (0, 0)),        # b1         (resident)
            pl.BlockSpec((Hp, 2 * Lp), lambda i, k: (0, 0)),   # [W2mu|W2lv](resident)
            pl.BlockSpec((1, 2 * Lp), lambda i, k: (0, 0)),    # [b2mu|b2lv](resident)
            pl.BlockSpec((Lp, Hp), lambda i, k: (0, 0)),       # W3         (resident)
            pl.BlockSpec((1, Hp), lambda i, k: (0, 0)),        # b3         (resident)
        ],
        out_specs=(
            pl.BlockSpec((tm, Lp), lambda i, k: (i, 0)),       # mu
            pl.BlockSpec((tm, Lp), lambda i, k: (i, 0)),       # logvar
            pl.BlockSpec((tm, Hp), lambda i, k: (i, 0)),       # d1 (decoder hidden)
        ),
        out_shape=(
            jax.ShapeDtypeStruct((Bp, Lp), f32),
            jax.ShapeDtypeStruct((Bp, Lp), f32),
            jax.ShapeDtypeStruct((Bp, Hp), cdt),
        ),
        scratch_shapes=[
            pltpu.VMEM((tm, Hp), f32),     # f32 accumulator for x @ W1t
            pltpu.VMEM((tm, 1), f32),      # row sum-of-squares (for the normalize)
        ],
        compiler_params=pltpu.CompilerParams(
            dimension_semantics=("parallel", "arbitrary"),
            vmem_limit_bytes=vmem_cap),
        interpret=interpret,
    )(xp, prep.w1_t, prep.b1, prep.w2_t, prep.b2, prep.w3_t, prep.b3)

    # ---- decoder: pure streamed GEMM (out = d1 @ W4t + b4), fully parallel -----
    out_p = pl.pallas_call(
        _decoder_kernel,
        grid=(Bp // tm, Nn // tn),
        in_specs=[
            pl.BlockSpec((tm, Hp), lambda i, j: (i, 0)),       # d1
            pl.BlockSpec((Hp, tn), lambda i, j: (0, j)),       # W4 tile    (streamed)
            pl.BlockSpec((1, tn), lambda i, j: (0, j)),        # b4 tile    (streamed)
        ],
        out_specs=pl.BlockSpec((tm, tn), lambda i, j: (i, j)),
        out_shape=jax.ShapeDtypeStruct((Bp, Nn), out_dtype),
        compiler_params=pltpu.CompilerParams(
            dimension_semantics=("parallel", "parallel"),
            vmem_limit_bytes=vmem_cap),
        interpret=interpret,
    )(d1_p, prep.w4_t, prep.b4)

    return out_p[:B, :N], mu_p[:B, :L], lv_p[:B, :L]


# ----------------------------------------------------------------------------
# Self-test
# ----------------------------------------------------------------------------
if __name__ == "__main__":
    key = jax.random.PRNGKey(0)
    # Small Multi-VAE: p_dims = [latent, hidden, n_items] = [64, 120, 300]
    # (odd hidden/latent dims deliberately exercise the lane-padding path).
    B, N, H, L = 10, 300, 120, 64
    ks = jax.random.split(key, 9)
    s = 4.0
    params = {
        "w1": jax.random.normal(ks[0], (H, N), jnp.float32) * (s / np.sqrt(N)),
        "b1": jax.random.normal(ks[1], (H,), jnp.float32) * 0.1,
        "w2": jax.random.normal(ks[2], (2 * L, H), jnp.float32) * (s / np.sqrt(H)),
        "b2": jax.random.normal(ks[3], (2 * L,), jnp.float32) * 0.1,
        "w3": jax.random.normal(ks[4], (H, L), jnp.float32) * (s / np.sqrt(L)),
        "b3": jax.random.normal(ks[5], (H,), jnp.float32) * 0.1,
        "w4": jax.random.normal(ks[6], (N, H), jnp.float32) * (s / np.sqrt(H)),
        "b4": jax.random.normal(ks[7], (N,), jnp.float32) * 0.1,
    }
    # Implicit-feedback-like binary input; one all-zero row exercises the
    # eps-clamped normalize (PyTorch: 0 / max(0, 1e-12) = 0).
    x = (jax.random.uniform(ks[8], (B, N), jnp.float32) > 0.8).astype(jnp.float32)
    x = x.at[3].set(0.0)

    def reference(x, p):
        norm = jnp.sqrt(jnp.sum(x * x, axis=1, keepdims=True))
        xn = x / jnp.maximum(norm, 1e-12)
        h1 = jnp.tanh(xn @ p["w1"].T + p["b1"])
        h2 = h1 @ p["w2"].T + p["b2"]
        mu, lv = h2[:, :L], h2[:, L:]
        d1 = jnp.tanh(mu @ p["w3"].T + p["b3"])
        out = d1 @ p["w4"].T + p["b4"]
        return out, mu, lv

    out_ref, mu_ref, lv_ref = jax.block_until_ready(reference(x, params))

    # 1) Strict check: f32 MXU path, small tiles so the multi-step accumulator
    #    and multi-batch-tile paths are exercised at these tiny demo shapes.
    prep_f32 = prepare_vae_params(params, compute_dtype=jnp.float32, tk=128, tn=128)
    fwd_f32 = jax.jit(functools.partial(
        vae_forward_pallas, n_items=N, n_latent=L, tm=8, tk=128, tn=128))
    o32, m32, v32 = jax.block_until_ready(fwd_f32(x, prep_f32))
    np.testing.assert_allclose(np.asarray(o32), np.asarray(out_ref), rtol=1e-2, atol=1e-2)
    np.testing.assert_allclose(np.asarray(m32), np.asarray(mu_ref), rtol=1e-2, atol=1e-2)
    np.testing.assert_allclose(np.asarray(v32), np.asarray(lv_ref), rtol=1e-2, atol=1e-2)

    # 2) Performance configuration: bf16 MXU feeds, production default tiles
    #    (tm=256, tk=tn=1024; auto-clamped for these tiny shapes); loose check.
    prep_bf16 = prepare_vae_params(params, compute_dtype=jnp.bfloat16)
    fwd_bf16 = jax.jit(functools.partial(vae_forward_pallas, n_items=N, n_latent=L))
    out, mu, lv = jax.block_until_ready(fwd_bf16(x, prep_bf16))
    np.testing.assert_allclose(np.asarray(out), np.asarray(out_ref), rtol=1e-1, atol=1e-1)
    np.testing.assert_allclose(np.asarray(mu), np.asarray(mu_ref), rtol=1e-1, atol=1e-1)
    np.testing.assert_allclose(np.asarray(lv), np.asarray(lv_ref), rtol=1e-1, atol=1e-1)

    print("KERNEL_OK")
</pallas_src>

<mosaic_0001>
module attributes {stable_mosaic.version = 11 : i64} {
  func.func @_decoder_kernel(%arg0: i32, %arg1: i32, %arg2: memref<8x128xf32, #tpu.memory_space<vmem>>, %arg3: memref<128x128xf32, #tpu.memory_space<vmem>>, %arg4: memref<1x128xf32, #tpu.memory_space<vmem>>, %arg5: memref<8x128xf32, #tpu.memory_space<vmem>>) attributes {dimension_semantics = [#tpu.dimension_semantics<parallel>, #tpu.dimension_semantics<parallel>], iteration_bounds = array<i64: 2, 3>, scalar_prefetch = 0 : i64, scratch_operands = 0 : i64, tpu.core_type = #tpu.core_type<tc>, window_params = [{transform_indices = @transform_0, window_bounds = array<i64: 8, 128>}, {transform_indices = @transform_1, window_bounds = array<i64: 128, 128>}, {transform_indices = @transform_2, window_bounds = array<i64: 1, 128>}, {transform_indices = @transform_3, window_bounds = array<i64: 8, 128>}]} {
    %c0 = arith.constant 0 : index
    %c0_0 = arith.constant 0 : index
    %0 = vector.load %arg2[%c0, %c0_0] : memref<8x128xf32, #tpu.memory_space<vmem>>, vector<8x128xf32>
    %c0_1 = arith.constant 0 : index
    %c0_2 = arith.constant 0 : index
    %1 = vector.load %arg3[%c0_1, %c0_2] : memref<128x128xf32, #tpu.memory_space<vmem>>, vector<128x128xf32>
    %cst = arith.constant dense<0.000000e+00> : vector<8x128xf32>
    %2 = tpu.matmul %0, %1, %cst {dimension_numbers = #tpu.dot_dimension_numbers<[1], [0], [0], [1], [0, 0, 1, 1], [], []>} : vector<8x128xf32>, vector<128x128xf32>, vector<8x128xf32> -> vector<8x128xf32>
    %c0_3 = arith.constant 0 : index
    %c0_4 = arith.constant 0 : index
    %3 = vector.load %arg4[%c0_3, %c0_4] : memref<1x128xf32, #tpu.memory_space<vmem>>, vector<1x128xf32>
    %4 = vector.broadcast %3 : vector<1x128xf32> to vector<8x128xf32>
    %5 = arith.addf %2, %4 : vector<8x128xf32>
    %c0_5 = arith.constant 0 : index
    %c0_6 = arith.constant 0 : index
    %6 = vector.load %arg5[%c0_5, %c0_6] : memref<8x128xf32, #tpu.memory_space<vmem>>, vector<8x128xf32>
    tpu.vector_store %arg5[%c0_5, %c0_6], %5 {strides = array<i32>} : memref<8x128xf32, #tpu.memory_space<vmem>>, vector<8x128xf32>,
    return
  }
  func.func @transform_0(%arg0: i32, %arg1: i32) -> (i32, i32) {
    %c0_i32 = arith.constant 0 : i32
    %c0_i32_0 = arith.constant 0 : i32
    return %arg0, %c0_i32 : i32, i32
  }
  func.func @transform_1(%arg0: i32, %arg1: i32) -> (i32, i32) {
    %c0_i32 = arith.constant 0 : i32
    %c0_i32_0 = arith.constant 0 : i32
    return %c0_i32, %arg1 : i32, i32
  }
  func.func @transform_2(%arg0: i32, %arg1: i32) -> (i32, i32) {
    %c0_i32 = arith.constant 0 : i32
    %c0_i32_0 = arith.constant 0 : i32
    return %c0_i32, %arg1 : i32, i32
  }
  func.func @transform_3(%arg0: i32, %arg1: i32) -> (i32, i32) {
    %c0_i32 = arith.constant 0 : i32
    return %arg0, %arg1 : i32, i32
  }
}

module attributes {stable_mosaic.version = 11 : i64} {
  func.func @_encoder_kernel(%arg0: i32, %arg1: i32, %arg2: memref<8x128xf32, #tpu.memory_space<vmem>>, %arg3: memref<128x128xf32, #tpu.memory_space<vmem>>, %arg4: memref<1x128xf32, #tpu.memory_space<vmem>>, %arg5: memref<128x256xf32, #tpu.memory_space<vmem>>, %arg6: memref<1x256xf32, #tpu.memory_space<vmem>>, %arg7: memref<128x128xf32, #tpu.memory_space<vmem>>, %arg8: memref<1x128xf32, #tpu.memory_space<vmem>>, %arg9: memref<8x128xf32, #tpu.memory_space<vmem>>, %arg10: memref<8x128xf32, #tpu.memory_space<vmem>>, %arg11: memref<8x128xf32, #tpu.memory_space<vmem>>, %arg12: memref<8x128xf32, #tpu.memory_space<vmem>>, %arg13: memref<8x1xf32, #tpu.memory_space<vmem>>) attributes {dimension_semantics = [#tpu.dimension_semantics<parallel>, #tpu.dimension_semantics<arbitrary>], iteration_bounds = array<i64: 2, 3>, scalar_prefetch = 0 : i64, scratch_operands = 2 : i64, tpu.core_type = #tpu.core_type<tc>, window_params = [{transform_indices = @transform_0, window_bounds = array<i64: 8, 128>}, {transform_indices = @transform_1, window_bounds = array<i64: 128, 128>}, {pipeline_mode = #tpu.pipeline_mode<synchronous>, transform_indices = @transform_2, window_bounds = array<i64: 1, 128>}, {pipeline_mode = #tpu.pipeline_mode<synchronous>, transform_indices = @transform_3, window_bounds = array<i64: 128, 256>}, {pipeline_mode = #tpu.pipeline_mode<synchronous>, transform_indices = @transform_4, window_bounds = array<i64: 1, 256>}, {pipeline_mode = #tpu.pipeline_mode<synchronous>, transform_indices = @transform_5, window_bounds = array<i64: 128, 128>}, {pipeline_mode = #tpu.pipeline_mode<synchronous>, transform_indices = @transform_6, window_bounds = array<i64: 1, 128>}, {transform_indices = @transform_7, window_bounds = array<i64: 8, 128>}, {transform_indices = @transform_8, window_bounds = array<i64: 8, 128>}, {transform_indices = @transform_9, window_bounds = array<i64: 8, 128>}]} {
    %c0_i32 = arith.constant 0 : i32
    %0 = arith.cmpi eq, %arg1, %c0_i32 : i32
    %1 = arith.extui %0 : i1 to i32
    %c0_i32_0 = arith.constant 0 : i32
    %2 = arith.cmpi ne, %1, %c0_i32_0 : i32
    scf.if %2 {
      %cst_14 = arith.constant 0.000000e+00 : f32
      %18 = vector.broadcast %cst_14 : f32 to vector<8x128xf32>
      %c0_15 = arith.constant 0 : index
      %c0_16 = arith.constant 0 : index
      %19 = vector.load %arg12[%c0_15, %c0_16] : memref<8x128xf32, #tpu.memory_space<vmem>>, vector<8x128xf32>
      tpu.vector_store %arg12[%c0_15, %c0_16], %18 {strides = array<i32>} : memref<8x128xf32, #tpu.memory_space<vmem>>, vector<8x128xf32>,
      %cst_17 = arith.constant 0.000000e+00 : f32
      %20 = vector.broadcast %cst_17 : f32 to vector<8x1xf32>
      %c0_18 = arith.constant 0 : index
      %c0_19 = arith.constant 0 : index
      %21 = vector.load %arg13[%c0_18, %c0_19] : memref<8x1xf32, #tpu.memory_space<vmem>>, vector<8x1xf32>
      tpu.vector_store %arg13[%c0_18, %c0_19], %20 {strides = array<i32>} : memref<8x1xf32, #tpu.memory_space<vmem>>, vector<8x1xf32>,
    } else {
    }
    %c0 = arith.constant 0 : index
    %c0_1 = arith.constant 0 : index
    %3 = vector.load %arg2[%c0, %c0_1] : memref<8x128xf32, #tpu.memory_space<vmem>>, vector<8x128xf32>
    %c0_2 = arith.constant 0 : index
    %c0_3 = arith.constant 0 : index
    %4 = vector.load %arg13[%c0_2, %c0_3] : memref<8x1xf32, #tpu.memory_space<vmem>>, vector<8x1xf32>
    %5 = arith.mulf %3, %3 : vector<8x128xf32>
    %cst = arith.constant dense<0.000000e+00> : vector<8xf32>
    %6 = vector.multi_reduction <add>, %5, %cst [1] : vector<8x128xf32> to vector<8xf32>
    %7 = vector.shape_cast %6 : vector<8xf32> to vector<8x1xf32>
    %8 = arith.addf %4, %7 : vector<8x1xf32>
    %c0_4 = arith.constant 0 : index
    %c0_5 = arith.constant 0 : index
    %9 = vector.load %arg13[%c0_4, %c0_5] : memref<8x1xf32, #tpu.memory_space<vmem>>, vector<8x1xf32>
    tpu.vector_store %arg13[%c0_4, %c0_5], %8 {strides = array<i32>} : memref<8x1xf32, #tpu.memory_space<vmem>>, vector<8x1xf32>,
    %c0_6 = arith.constant 0 : index
    %c0_7 = arith.constant 0 : index
    %10 = vector.load %arg12[%c0_6, %c0_7] : memref<8x128xf32, #tpu.memory_space<vmem>>, vector<8x128xf32>
    %c0_8 = arith.constant 0 : index
    %c0_9 = arith.constant 0 : index
    %11 = vector.load %arg3[%c0_8, %c0_9] : memref<128x128xf32, #tpu.memory_space<vmem>>, vector<128x128xf32>
    %cst_10 = arith.constant dense<0.000000e+00> : vector<8x128xf32>
    %12 = tpu.matmul %3, %11, %cst_10 {dimension_numbers = #tpu.dot_dimension_numbers<[1], [0], [0], [1], [0, 0, 1, 1], [], []>} : vector<8x128xf32>, vector<128x128xf32>, vector<8x128xf32> -> vector<8x128xf32>
    %13 = arith.addf %10, %12 : vector<8x128xf32>
    %c0_11 = arith.constant 0 : index
    %c0_12 = arith.constant 0 : index
    %14 = vector.load %arg12[%c0_11, %c0_12] : memref<8x128xf32, #tpu.memory_space<vmem>>, vector<8x128xf32>
    tpu.vector_store %arg12[%c0_11, %c0_12], %13 {strides = array<i32>} : memref<8x128xf32, #tpu.memory_space<vmem>>, vector<8x128xf32>,
    %c2_i32 = arith.constant 2 : i32
    %15 = arith.cmpi eq, %arg1, %c2_i32 : i32
    %16 = arith.extui %15 : i1 to i32
    %c0_i32_13 = arith.constant 0 : i32
    %17 = arith.cmpi ne, %16, %c0_i32_13 : i32
    scf.if %17 {
      %c0_14 = arith.constant 0 : index
      %c0_15 = arith.constant 0 : index
      %18 = vector.load %arg13[%c0_14, %c0_15] : memref<8x1xf32, #tpu.memory_space<vmem>>, vector<8x1xf32>
      %cst_16 = arith.constant 1.000000e-24 : f32
      %19 = vector.broadcast %cst_16 : f32 to vector<8x1xf32>
      %20 = arith.maximumf %18, %19 : vector<8x1xf32>
      %21 = math.rsqrt %20 : vector<8x1xf32>
      %c0_17 = arith.constant 0 : index
      %c0_18 = arith.constant 0 : index
      %22 = vector.load %arg12[%c0_17, %c0_18] : memref<8x128xf32, #tpu.memory_space<vmem>>, vector<8x128xf32>
      %23 = vector.broadcast %21 : vector<8x1xf32> to vector<8x128xf32>
      %24 = arith.mulf %22, %23 : vector<8x128xf32>
      %c0_19 = arith.constant 0 : index
      %c0_20 = arith.constant 0 : index
      %25 = vector.load %arg4[%c0_19, %c0_20] : memref<1x128xf32, #tpu.memory_space<vmem>>, vector<1x128xf32>
      %26 = vector.broadcast %25 : vector<1x128xf32> to vector<8x128xf32>
      %27 = arith.addf %24, %26 : vector<8x128xf32>
      %28 = math.tanh %27 : vector<8x128xf32>
      %c0_21 = arith.constant 0 : index
      %c0_22 = arith.constant 0 : index
      %29 = vector.load %arg5[%c0_21, %c0_22] : memref<128x256xf32, #tpu.memory_space<vmem>>, vector<128x256xf32>
      %cst_23 = arith.constant dense<0.000000e+00> : vector<8x256xf32>
      %30 = tpu.matmul %28, %29, %cst_23 {dimension_numbers = #tpu.dot_dimension_numbers<[1], [0], [0], [1], [0, 0, 1, 1], [], []>} : vector<8x128xf32>, vector<128x256xf32>, vector<8x256xf32> -> vector<8x256xf32>
      %c0_24 = arith.constant 0 : index
      %c0_25 = arith.constant 0 : index
      %31 = vector.load %arg6[%c0_24, %c0_25] : memref<1x256xf32, #tpu.memory_space<vmem>>, vector<1x256xf32>
      %32 = vector.broadcast %31 : vector<1x256xf32> to vector<8x256xf32>
      %33 = arith.addf %30, %32 : vector<8x256xf32>
      %34 = vector.extract_strided_slice %33 {offsets = [0, 0], sizes = [8, 128], strides = [1, 1]} : vector<8x256xf32> to vector<8x128xf32>
      %35 = vector.extract_strided_slice %33 {offsets = [0, 128], sizes = [8, 128], strides = [1, 1]} : vector<8x256xf32> to vector<8x128xf32>
      %c0_26 = arith.constant 0 : index
      %c0_27 = arith.constant 0 : index
      %36 = vector.load %arg9[%c0_26, %c0_27] : memref<8x128xf32, #tpu.memory_space<vmem>>, vector<8x128xf32>
      tpu.vector_store %arg9[%c0_26, %c0_27], %34 {strides = array<i32>} : memref<8x128xf32, #tpu.memory_space<vmem>>, vector<8x128xf32>,
      %c0_28 = arith.constant 0 : index
      %c0_29 = arith.constant 0 : index
      %37 = vector.load %arg10[%c0_28, %c0_29] : memref<8x128xf32, #tpu.memory_space<vmem>>, vector<8x128xf32>
      tpu.vector_store %arg10[%c0_28, %c0_29], %35 {strides = array<i32>} : memref<8x128xf32, #tpu.memory_space<vmem>>, vector<8x128xf32>,
      %c0_30 = arith.constant 0 : index
      %c0_31 = arith.constant 0 : index
      %38 = vector.load %arg7[%c0_30, %c0_31] : memref<128x128xf32, #tpu.memory_space<vmem>>, vector<128x128xf32>
      %cst_32 = arith.constant dense<0.000000e+00> : vector<8x128xf32>
      %39 = tpu.matmul %34, %38, %cst_32 {dimension_numbers = #tpu.dot_dimension_numbers<[1], [0], [0], [1], [0, 0, 1, 1], [], []>} : vector<8x128xf32>, vector<128x128xf32>, vector<8x128xf32> -> vector<8x128xf32>
      %c0_33 = arith.constant 0 : index
      %c0_34 = arith.constant 0 : index
      %40 = vector.load %arg8[%c0_33, %c0_34] : memref<1x128xf32, #tpu.memory_space<vmem>>, vector<1x128xf32>
      %41 = vector.broadcast %40 : vector<1x128xf32> to vector<8x128xf32>
      %42 = arith.addf %39, %41 : vector<8x128xf32>
      %43 = math.tanh %42 : vector<8x128xf32>
      %c0_35 = arith.constant 0 : index
      %c0_36 = arith.constant 0 : index
      %44 = vector.load %arg11[%c0_35, %c0_36] : memref<8x128xf32, #tpu.memory_space<vmem>>, vector<8x128xf32>
      tpu.vector_store %arg11[%c0_35, %c0_36], %43 {strides = array<i32>} : memref<8x128xf32, #tpu.memory_space<vmem>>, vector<8x128xf32>,
    } else {
    }
    return
  }
  func.func @transform_0(%arg0: i32, %arg1: i32) -> (i32, i32) {
    %c0_i32 = arith.constant 0 : i32
    return %arg0, %arg1 : i32, i32
  }
  func.func @transform_1(%arg0: i32, %arg1: i32) -> (i32, i32) {
    %c0_i32 = arith.constant 0 : i32
    %c0_i32_0 = arith.constant 0 : i32
    return %arg1, %c0_i32 : i32, i32
  }
  func.func @transform_2(%arg0: i32, %arg1: i32) -> (i32, i32) {
    %c0_i32 = arith.constant 0 : i32
    %c0_i32_0 = arith.constant 0 : i32
    %c0_i32_1 = arith.constant 0 : i32
    return %c0_i32, %c0_i32_0 : i32, i32
  }
  func.func @transform_3(%arg0: i32, %arg1: i32) -> (i32, i32) {
    %c0_i32 = arith.constant 0 : i32
    %c0_i32_0 = arith.constant 0 : i32
    %c0_i32_1 = arith.constant 0 : i32
    return %c0_i32, %c0_i32_0 : i32, i32
  }
  func.func @transform_4(%arg0: i32, %arg1: i32) -> (i32, i32) {
    %c0_i32 = arith.constant 0 : i32
    %c0_i32_0 = arith.constant 0 : i32
    %c0_i32_1 = arith.constant 0 : i32
    return %c0_i32, %c0_i32_0 : i32, i32
  }
  func.func @transform_5(%arg0: i32, %arg1: i32) -> (i32, i32) {
    %c0_i32 = arith.constant 0 : i32
    %c0_i32_0 = arith.constant 0 : i32
    %c0_i32_1 = arith.constant 0 : i32
    return %c0_i32, %c0_i32_0 : i32, i32
  }
  func.func @transform_6(%arg0: i32, %arg1: i32) -> (i32, i32) {
    %c0_i32 = arith.constant 0 : i32
    %c0_i32_0 = arith.constant 0 : i32
    %c0_i32_1 = arith.constant 0 : i32
    return %c0_i32, %c0_i32_0 : i32, i32
  }
  func.func @transform_7(%arg0: i32, %arg1: i32) -> (i32, i32) {
    %c0_i32 = arith.constant 0 : i32
    %c0_i32_0 = arith.constant 0 : i32
    return %arg0, %c0_i32 : i32, i32
  }
  func.func @transform_8(%arg0: i32, %arg1: i32) -> (i32, i32) {
    %c0_i32 = arith.constant 0 : i32
    %c0_i32_0 = arith.constant 0 : i32
    return %arg0, %c0_i32 : i32, i32
  }
  func.func @transform_9(%arg0: i32, %arg1: i32) -> (i32, i32) {
    %c0_i32 = arith.constant 0 : i32
    %c0_i32_0 = arith.constant 0 : i32
    return %arg0, %c0_i32 : i32, i32
  }
}

</mosaic_0001>

<bundles_post_ra>
// kernel: vae_forward_pallas.3
= control target key start
LH: loop header
LB: loop body
LE: loop exit
PB: predicated region body
PF: predicated region fallthrough
CT: control target
= control target key end

     0   :  { %s899_s0 = inlined_call_operand.vmem [shape: f32[16,128], index: 0, kind: input, shape index: {}]   ;;  %s900_s1 = inlined_call_operand.hbm [shape: f32[128,384], index: 1, kind: input, shape index: {}]   ;;  %s901_s2 = inlined_call_operand.vmem [shape: f32[1,384], index: 2, kind: input, shape index: {}]   ;;  %s902_s3 = inlined_call_operand.hbm [shape: f32[16,384], index: 3, kind: output, shape index: {}]  }
   0x1   :  { %906 = sst [smem:[#allocation12_spill]] %s900_s1 }
   0x2   :  { %8 = vsyncpa [#allocation3], 0 }
   0x3   :  { %10 = vsyncpa [#allocation3 + $0x1], 0 }
   0x4   :  { %11 = vsyncpa [#allocation4], 0 }
   0x5   :  { %13 = vsyncpa [#allocation4 + $0x1], 0  ;;  %s697_s12 = smov 0   ;;  %s699_s13 = smov 0  }
   0x6   :  { %s701_s14 = smov 0   ;;  %s703_s15 = smov 0  }
   0x7   :  { %s705_s16 = smov 0   ;;  %s707_s17 = smov 0  }
   0x8   :  { %s709_s18 = smov 0   ;;  %s711_s19 = smov 0  }
   0x9   :  { %s713_s20 = smov 0   ;;  %s715_s21 = smov 0  }
   0xa   :  { %s717_s22 = smov 0  }
   0xb LB: > { %907 = sst [smem:[#allocation8_spill]] %s668_s21  ;;  %s399_s23 = sadd.s32 4294967295, %s672_s22   ;;  %s672_s22 = sphi %s717_s22, %s19_s22   ;;  %s668_s21 = sphi %s715_s21, %s920_s21   ;;  %s664_s20 = sphi %s713_s20, %s928_s20   ;;  %s660_s19 = sphi %s711_s19, %s918_s19   ;;  %s656_s18 = sphi %s709_s18, %s927_s18   ;;  %s652_s17 = sphi %s707_s17, %s926_s17   ;;  %s648_s16 = sphi %s705_s16, %s925_s16   ;;  %s644_s15 = sphi %s703_s15, %s924_s15   ;;  %s640_s14 = sphi %s701_s14, %s923_s14   ;;  %s636_s13 = sphi %s699_s13, %s922_s13   ;;  %s632_s12 = sphi %s697_s12, %s921_s12  }
   0xc   : > { %s400_s24 = sadd.s32 4294967294, %s672_s22   ;;  %s28_s25 = sadd.s32 1, %s664_s20 }
   0xd   : > { %s31_s26 = sadd.s32 1, %s668_s21  ;;  %p29_p0 = scmp.ge.s32.totalorder %s28_s25, 3 }
   0xe   : > { %s64_s27 = sadd.s32 1, %s652_s17  ;;  %p71_p1 = scmp.ne.s32.totalorder %s652_s17, %s648_s16 }
   0xf   : > { %p72_p2 = scmp.eq.s32.totalorder %s672_s22, 0  ;;  %s930_s25 = smov (%p29_p0, %s28_s25), 0 }
  0x10   : > { %908 = sst [smem:[#allocation9_spill]] %s930_s25  ;;  %s932_s26 = smov (!%p29_p0, %s31_s26), %s668_s21 }
  0x11   : > { %s61_s28 = ssub.s32 %s664_s20, %s930_s25  ;;  %p763_p3 = por %p72_p2, %p71_p1 }
  0x12   : > { %p33_p4 = scmp.ge.s32.totalorder %s932_s26, 2  ;;  %p62_p5 = scmp.eq.s32.totalorder %s61_s28, 0 }
  0x13   : > { %p77_p6 = scmp.ne.s32.totalorder %s648_s16, %s644_s15  ;;  %p78_p7 = scmp.eq.s32.totalorder %s399_s23, 0 }
  0x14   : > { %s934_s26 = smov (%p33_p4, %s932_s26), 0  ;;  %s118_s7 = sadd.s32 1, %s640_s14 }
  0x15   : > { %910 = sst [smem:[#allocation10_spill]] %s934_s26  ;;  %p773_p8 = por %p78_p7, %p77_p6 }
  0x16   : > { %s771_s30 = scalar_select %p62_p5, %s652_s17, %s64_s27  }
  0x17   : > { %s113_s5 = ssub.s32 %s668_s21, %s934_s26  ;;  %p128_p10 = scmp.ne.s32.totalorder %s640_s14, %s636_s13 }
  0x18   : > { %911 = sst [smem:[#allocation11_spill]] %s771_s30  ;;  %s115_s6 = sor.u32 %s113_s5, %s61_s28 }
  0x19   : > { %p116_p9 = scmp.eq.s32.totalorder %s115_s6, 0  ;;  %p129_p11 = scmp.eq.s32.totalorder %s399_s23, 5 }
  0x1a   : > { %p134_p12 = scmp.ne.s32.totalorder %s636_s13, %s632_s12  ;;  %p135_p0 = scmp.eq.s32.totalorder %s400_s24, 5 }
  0x1b   : > { %s785_s8 = scalar_select %p116_p9, %s640_s14, %s118_s7  }
  0x1c   : > { %p787_p13 = por %p129_p11, %p128_p10  ;;  %p426_p1 = scmp.lt.s32.totalorder %s672_s22, 6 }
  0x1d   : > { %p792_p2 = por %p135_p0, %p134_p12  ;;  %s162_s11 = sand.u32 1, %s652_s17  }
  0x1e   : > { %s403_s15 = sshll.u32 %s162_s11, 7  ;;  %s404_s27 = sshll.u32 %s664_s20, 3 }
  0x1f   : > { %s915_s1 = sld [smem:[#allocation12_spill]]  ;;  %s166_s6 = scalar_lea.vmem [#allocation2], %s403_s15 }
  0x20   : > { %s173_s7 = sshll.u32 %s166_s6, 4  ;;  %p419_p4 = pnand %p426_p1, %p763_p3  ;;  %s174_s7 = int_to_ptr.vmem [resolvable:$true] %s173_s7 }
  0x21   : > { %s163_s24 = scalar_lea.sflag [#allocation3], %s162_s11  ;;  %s674_s25 = smov 384  }
  0x22   : > { %s675_s21 = smov 128   ;;  %s676_s30 = smov 8  }
  0x23   : > { %p405_p5 = scmp.ge.s32.totalorder %s672_s22, 1  ;;  %p187_p6 = scmp.lt.s32.totalorder %s672_s22, 7 }
  0x25   : > { %s170_s5 = scalar_lea.hbm %s915_s1, %s404_s27  ;;  %p188_p7 = pnand %p405_p5, %p187_p6 }
  0x26   : > { %s171_s26 = sshll.u32 %s170_s5, 4  ;;  %s193_s23 = sand.u32 (!%p188_p7), 1, %s648_s16   ;;  %s172_s26 = int_to_ptr.hbm [resolvable:$true] %s171_s26 }
  0x27   : > { %421 = dma.hbm_to_vmem [thread:$0]  (!%p419_p4), %s172_s26, 2048, %s174_s7, %s163_s24, %s674_s25, %s675_s21, %s676_s30  }
  0x28   : > { %191 = sbr.rel (%p188_p7) target bundleno = 209 (0xd1), region = 32  ;;  %s406_s27 = sshll.u32 (!%p188_p7), %s193_s23, 7 }
  0x29   : > { %s194_s15 = scalar_lea.sflag (!%p188_p7), [#allocation3], %s193_s23  ;;  %s806_s28 = scalar_lea.vmem (!%p188_p7), [#allocation2], %s406_s27 }
  0x2d   : > { %623 = dma.done.wait (%p773_p8), %s194_s15, 2048  }
  0x2e   : > { %625 = vsyncadd (%p773_p8), %s194_s15, 4294965248  ;;  %p232_p3 = scmp.lt.s32.totalorder %s656_s18, 2  ;;  %v251_v0 = vld [vmem:[%s806_s28 + $0x78] sm:$0xff]  ;;  %v250_v1 = vld [vmem:[%s806_s28 + $0x70] sm:$0xff]  ;;  %p228_p8 = scmp.lt.s32.totalorder %s660_s19, 1 }
  0x2f   : > { %256 = vmatpush.msra.mxu0 %v251_v0  ;;  %v249_v2 = vld [vmem:[%s806_s28 + $0x68] sm:$0xff]  ;;  %v248_v3 = vld [vmem:[%s806_s28 + $0x60] sm:$0xff]  ;;  %v247_v4 = vld [vmem:[%s806_s28 + $0x58] sm:$0xff]  ;;  %s413_s7 = smul.u32 3, %s660_s19  ;;  %s225_s24 = sand.u32 1, %s636_s13  }
  0x30   : > { %s816_s21 = scalar_select %p232_p3, %s656_s18, 2  ;;  %v246_v5 = vld [vmem:[%s806_s28 + $0x50] sm:$0xff]  ;;  %v245_v6 = vld [vmem:[%s806_s28 + $0x48] sm:$0xff]  ;;  %v244_v7 = vld [vmem:[%s806_s28 + $0x40] sm:$0xff] }
  0x31   : > { %257 = vmatpush.msra.mxu0 %v250_v1  ;;  %v243_v8 = vld [vmem:[%s806_s28 + $0x38] sm:$0xff]  ;;  %v242_v9 = vld [vmem:[%s806_s28 + $0x30] sm:$0xff]  ;;  %v241_v10 = vld [vmem:[%s806_s28 + $0x28] sm:$0xff]  ;;  %s229_s30 = scalar_select %p228_p8, %s660_s19, 1 }
  0x32   : > { %v240_v11 = vld [vmem:[%s806_s28 + $0x20] sm:$0xff]  ;;  %v239_v12 = vld [vmem:[%s806_s28 + $0x18] sm:$0xff]  ;;  %v238_v13 = vld [vmem:[%s806_s28 + $0x10] sm:$0xff]  ;;  %s288_s23 = sadd.s32 %s656_s18, %s413_s7  ;;  %s407_s27 = sshll.u32 %s225_s24, 3 }
  0x33   : > { %258 = vmatpush.msra.mxu0 %v249_v2  ;;  %s408_s4 = sshll.u32 %s229_s30, 3  ;;  %v237_v14 = vld [vmem:[%s806_s28 + $0x8] sm:$0xff]  ;;  %v236_v15 = vld [vmem:[%s806_s28] sm:$0xff]  ;;  %s410_s15 = sshll.u32 %s288_s23, 3 }
  0x34   : > { %s231_s6 = scalar_lea.vmem %s899_s0, %s408_s4  ;;  %s290_s30 = scalar_lea.hbm %s902_s3, %s410_s15 }
  0x35   : > { %259 = vmatpush.msra.mxu0 %v248_v3  ;;  %v235_v16 = vld [vmem:[%s231_s6] sm:$0xff]  ;;  %s916_s4 = scalar_lea.vmem %s901_s2, %s816_s21  ;;  %s227_s28 = scalar_lea.vmem [#allocation5], %s407_s27 }
  0x36   : > { %v519_v17 = vld [vmem:[%s916_s4] ss:$0 sm:$0xff]  ;;  %s292_s11 = sshll.u32 %s227_s28, 4  ;;  %s294_s5 = sshll.u32 %s290_s30, 4  ;;  %s293_s11 = int_to_ptr.vmem [resolvable:$true] %s292_s11  ;;  %s295_s5 = int_to_ptr.hbm [resolvable:$true] %s294_s5 }
  0x37   : > { %260 = vmatpush.msra.mxu0 %v247_v4  ;;  %s278_s18 = scalar_lea.sflag [#allocation4], %s225_s24  ;;  %s564_s19 = sshra.s32 %s295_s5, 4  ;;  %s565_s19 = int_to_ptr.hbm [resolvable:$true] %s564_s19 }
  0x38   : > { %s566_s6 = scalar_lea.hbm %s565_s19, 8  ;;  %s570_s21 = scalar_lea.hbm %s902_s3, 48 }
  0x39   : > { %261 = vmatpush.msra.mxu0 %v246_v5  ;;  %p567_p9 = scmp.ne.s32.totalorder %s565_s19, %s566_s6  ;;  %p571_p12 = scmp.lt.s32.totalorder %s565_s19, %s902_s3 }
  0x3a   : > { %p572_p0 = scmp.lt.s32.totalorder %s570_s21, %s566_s6 }
  0x3b   : > { %262 = vmatpush.msra.mxu0 %v245_v6  ;;  %p568_p10 = pnand %p567_p9, %p787_p13 }
  0x3c   : > { %p573_p1 = por %p572_p0, %p571_p12 }
  0x3d   : > { %263 = vmatpush.msra.mxu0 %v244_v7  ;;  %p569_p11 = pneg %p568_p10 }
  0x3f   : > { %264 = vmatpush.msra.mxu0 %v243_v8  ;;  %p574_p4 = pnand %p573_p1, %p569_p11 }
  0x41   : > { %265 = vmatpush.msra.mxu0 %v242_v9 }
  0x43   : > { %266 = vmatpush.msra.mxu0 %v241_v10 }
  0x45   : > { %267 = vmatpush.msra.mxu0 %v240_v11 }
  0x47   : > { %268 = vmatpush.msra.mxu0 %v239_v12 }
  0x49   : > { %269 = vmatpush.msra.mxu0 %v238_v13 }
  0x4b   : > { %270 = vmatpush.msra.mxu0 %v237_v14 }
  0x4d   : > { %271 = vmatpush.msra.mxu0 %v236_v15 }
  0x4e   : > { %272 = vmatmul.f32.vlgmr.msra.gmra.mxu0 %v235_v16 }
  0xcb   : > { %v273_v18 = vpop.f32.mrf.mxu0 }
  0xcc   : > { %v274_v19 = vadd.f32 %v519_v17, %v273_v18 }
  0xce   : > { %276 = vst [vmem:[%s227_s28] sm:$0xff] %v274_v19 }
  0xcf   : > { %577 = shalt.err (!%p574_p4)
}
  0xd0   : > { %416 = dma.vmem_to_hbm [thread:$0]  (%p787_p13), %s293_s11, 128, %s295_s5, %s278_s18  }
  0xd1 PF: > { %p427_p5 = scmp.ge.s32.totalorder %s672_s22, 2  ;;  %s306_s24 = sand.u32 1, %s632_s12  }
  0xd2   : > { %s307_s27 = scalar_lea.sflag [#allocation4], %s306_s24 }
  0xd3   : > { %p423_p6 = pnand %p427_p5, %p792_p2 }
  0xd5   : > { %p424_p7 = pneg %p423_p6 }
  0xd7   : > { %627 = dma.done.wait (%p424_p7), %s307_s27, 128  }
  0xd8   : > { %629 = vsyncadd (%p424_p7), %s307_s27, 4294967168  ;;  %s19_s22 = sadd.s32 1, %s672_s22   ;;  %s917_s9 = sld [smem:[#allocation11_spill]] }
  0xd9   : > { %p16_p3 = scmp.ge.s32.totalorder %s19_s22, 8   ;;  %s918_s19 = sld [smem:[#allocation8_spill]] }
  0xda   : > { %s919_s25 = sld [smem:[#allocation9_spill]]  ;;  %s921_s12 = smov %s636_s13 }
  0xdb   : > { %s920_s21 = sld [smem:[#allocation10_spill]]  ;;  %s922_s13 = smov %s640_s14 }
  0xdc   : > { %s923_s14 = smov %s785_s8  ;;  %s924_s15 = smov %s648_s16 }
  0xdd   : > { %s925_s16 = smov %s652_s17  ;;  %s927_s18 = smov %s664_s20 }
  0xde   : > { %s926_s17 = smov %s917_s9  ;;  %18 = sbr.rel (!%p16_p3) target bundleno = 11 (0xb), region = 83 }
  0xe0   : > { %s928_s20 = smov %s919_s25 }
  0xe3   :  { %313 = vsyncpa [#allocation3], 1 }
  0xe4   :  { %315 = vsyncpa [#allocation3 + $0x1], 1 }
  0xe5   :  { %316 = vsyncpa [#allocation4], 1 }
  0xe6   :  { %318 = vsyncpa [#allocation4 + $0x1], 1 }

// kernel: vae_forward_pallas.2
= control target key start
LH: loop header
LB: loop body
LE: loop exit
PB: predicated region body
PF: predicated region fallthrough
CT: control target
= control target key end

     0   :  { %s1620_s0 = inlined_call_operand.vmem [shape: f32[16,384], index: 0, kind: input, shape index: {}]   ;;  %s1621_s1 = inlined_call_operand.hbm [shape: f32[384,128], index: 1, kind: input, shape index: {}]   ;;  %s1622_s2 = inlined_call_operand.vmem [shape: f32[1,128], index: 2, kind: input, shape index: {}]   ;;  %s1623_s3 = inlined_call_operand.hbm [shape: f32[128,256], index: 3, kind: input, shape index: {}]   ;;  %s1624_s4 = inlined_call_operand.vmem [shape: f32[1,256], index: 4, kind: input, shape index: {}]   ;;  %s1625_s5 = inlined_call_operand.hbm [shape: f32[128,128], index: 5, kind: input, shape index: {}]   ;;  %s1626_s6 = inlined_call_operand.vmem [shape: f32[1,128], index: 6, kind: input, shape index: {}]   ;;  %s1627_s7 = inlined_call_operand.hbm [shape: f32[16,128], index: 7, kind: output, shape index: {0}]   ;;  %s1628_s8 = inlined_call_operand.hbm [shape: f32[16,128], index: 8, kind: output, shape index: {1}]   ;;  %s1629_s9 = inlined_call_operand.vmem [shape: f32[16,128], index: 9, kind: output, shape index: {2}]  }
   0x1   :  { %1640 = sst [smem:[#allocation22_spill]] %s1622_s2 }
   0x2   :  { %1641 = sst [smem:[#allocation23_spill]] %s1623_s3 }
   0x3   :  { %1642 = sst [smem:[#allocation24_spill]] %s1624_s4 }
   0x4   :  { %1643 = sst [smem:[#allocation25_spill]] %s1625_s5 }
   0x5   :  { %1644 = sst [smem:[#allocation26_spill]] %s1626_s6 }
   0x6   :  { %1645 = sst [smem:[#allocation27_spill]] %s1627_s7 }
   0x7   :  { %1646 = sst [smem:[#allocation28_spill]] %s1628_s8 }
   0x8   :  { %15 = vsyncpa [#allocation5], 0 }
   0x9   :  { %17 = vsyncpa [#allocation5 + $0x1], 0 }
   0xa   :  { %18 = vsyncpa [#allocation8], 0 }
   0xb   :  { %19 = vsyncpa [#allocation6], 0 }
   0xc   :  { %21 = vsyncpa [#allocation6 + $0x1], 0 }
   0xd   :  { %22 = vsyncpa [#allocation12], 0 }
   0xe   :  { %24 = vsyncpa [#allocation12 + $0x1], 0  ;;  %s1351_s30 = smov 0   ;;  %s1353_s10 = smov 0  }
   0xf   :  { %s1355_s11 = smov 0   ;;  %s1357_s12 = smov 0  }
  0x10   :  { %s1359_s13 = smov 0   ;;  %s1361_s14 = smov 0  }
  0x11   :  { %s1363_s15 = smov 0   ;;  %s1365_s16 = smov 0  }
  0x12   :  { %s1367_s17 = smov 0   ;;  %s1369_s18 = smov 0  }
  0x13   :  { %s1371_s19 = smov 0  }
  0x14 LB: > { %1647 = sst [smem:[#allocation17_spill]] %s1251_s30  ;;  %s873_s20 = sadd.s32 4294967295, %s1291_s19   ;;  %s1291_s19 = sphi %s1371_s19, %s30_s19   ;;  %s1287_s18 = sphi %s1369_s18, %s1682_s18   ;;  %s1283_s17 = sphi %s1367_s17, %s1681_s17   ;;  %s1279_s16 = sphi %s1365_s16, %s1680_s16   ;;  %s1275_s15 = sphi %s1363_s15, %s1679_s15   ;;  %s1271_s14 = sphi %s1361_s14, %s1678_s14   ;;  %s1267_s13 = sphi %s1359_s13, %s1677_s13   ;;  %s1263_s12 = sphi %s1357_s12, %s1676_s12   ;;  %s1259_s11 = sphi %s1355_s11, %s1675_s11   ;;  %s1255_s10 = sphi %s1353_s10, %s1674_s10   ;;  %s1251_s30 = sphi %s1351_s30, %s1673_s30  }
  0x15   : > { %s874_s21 = sadd.s32 4294967294, %s1291_s19   ;;  %p90_p0 = scmp.ne.s32.totalorder %s1267_s13, %s1263_s12 }
  0x16   : > { %p1407_p1 = scmp.eq.s32.totalorder %s873_s20, 0  ;;  %p218_p2 = scmp.ne.s32.totalorder %s1259_s11, %s1255_s10 }
  0x17   : > { %p219_p4 = scmp.eq.s32.totalorder %s873_s20, 5  ;;  %p224_p5 = scmp.ne.s32.totalorder %s1255_s10, %s1251_s30 }
  0x18   : > { %p1416_p3 = por %p1407_p1, %p90_p0  ;;  %p225_p6 = scmp.eq.s32.totalorder %s874_s21, 5 }
  0x19   : > { %p1422_p7 = por %p219_p4, %p218_p2  ;;  %p875_p8 = scmp.ge.s32.totalorder %s1291_s19, 1 }
  0x1a   : > { %p1427_p9 = por %p225_p6, %p224_p5  ;;  %p284_p10 = scmp.lt.s32.totalorder %s1291_s19, 7 }
  0x1b   : > { %s1650_s25 = scalar_select %p1422_p7, 1, 0 }
  0x1c   : > { %s1652_s26 = scalar_select %p1427_p9, 1, 0 }
  0x1d   : > { %1651 = sst [smem:[#allocation18_spill]] %s1650_s25  ;;  %p1435_p11 = pnand %p875_p8, %p284_p10 }
  0x1e   : > { %1653 = sst [smem:[#allocation19_spill]] %s1652_s26  ;;  %s1293_s20 = smov [#allocation7]  }
  0x1f   : > { %s1654_s3 = sld [smem:[#allocation23_spill]]  ;;  %p914_p12 = pneg %p1435_p11 }
  0x20   : > { %s300_s21 = sshll.u32 %s1293_s20, 4  ;;  %s1656_s5 = sld [smem:[#allocation25_spill]]  ;;  %s301_s21 = int_to_ptr.vmem [resolvable:$true] %s300_s21 }
  0x21   : > { %p915_p13 = pnand %p914_p12, %p1407_p1  ;;  %s1294_s28 = smov 256  }
  0x22   : > { %s1296_s30 = smov [#allocation9]   ;;  %s1634_s20 = smov 128  }
  0x23   : > { %s317_s8 = sshll.u32 %s1296_s30, 4  ;;  %s1635_s7 = smov 8   ;;  %s318_s8 = int_to_ptr.vmem [resolvable:$true] %s317_s8 }
  0x24   : > { %s39_s23 = sadd.s32 1, %s1283_s17  ;;  %s42_s26 = sadd.s32 1, %s1287_s18 }
  0x25   : > { %s298_s29 = sshll.u32 %s1654_s3, 4  ;;  %s1295_s3 = smov 16   ;;  %s299_s29 = int_to_ptr.hbm [resolvable:$true] %s298_s29 }
  0x26   : > { %s315_s27 = sshll.u32 %s1656_s5, 4  ;;  %p40_p0 = scmp.ge.s32.totalorder %s39_s23, 3  ;;  %s316_s27 = int_to_ptr.hbm [resolvable:$true] %s315_s27 }
  0x27   : > { %917 = dma.hbm_to_vmem [thread:$0]  (!%p915_p13), %s299_s29, 4096, %s301_s21, [#allocation8], %s1294_s28, %s1294_s28, %s1295_s3  }
  0x28   : > { %920 = dma.hbm_to_vmem [thread:$0]  (!%p915_p13), %s316_s27, 2048, %s318_s8, [#allocation8], %s1634_s20, %s1634_s20, %s1635_s7  }
  0x29   : > { %s77_s5 = sadd.s32 1, %s1271_s14  ;;  %p84_p2 = scmp.ne.s32.totalorder %s1271_s14, %s1267_s13 }
  0x2a   : > { %p85_p4 = scmp.eq.s32.totalorder %s1291_s19, 0  ;;  %s1684_s23 = smov (%p40_p0, %s39_s23), 0 }
  0x2b   : > { %1657 = sst [smem:[#allocation20_spill]] %s1684_s23  ;;  %s1686_s26 = smov (!%p40_p0, %s42_s26), %s1287_s18 }
  0x2c   : > { %s74_s3 = ssub.s32 %s1283_s17, %s1684_s23  ;;  %p1460_p5 = por %p85_p4, %p84_p2 }
  0x2d   : > { %p44_p6 = scmp.ge.s32.totalorder %s1686_s26, 2  ;;  %p75_p8 = scmp.eq.s32.totalorder %s74_s3, 0 }
  0x2e   : > { %p934_p10 = scmp.lt.s32.totalorder %s1291_s19, 6  ;;  %s345_s8 = sand.u32 1, %s1271_s14  }
  0x2f   : > { %s1688_s26 = smov (%p44_p6, %s1686_s26), 0  ;;  %s879_s27 = sshll.u32 %s345_s8, 7 }
  0x30   : > { %1659 = sst [smem:[#allocation21_spill]] %s1688_s26  ;;  %s205_s21 = ssub.s32 %s1287_s18, %s1688_s26 }
  0x31   : > { %s1469_s29 = scalar_select %p75_p8, %s1271_s14, %s77_s5  }
  0x32   : > { %p206_p12 = scmp.eq.s32.totalorder %s205_s21, 0  ;;  %s898_s28 = sshll.u32 %s1283_s17, 7 }
  0x33   : > { %s1660_s20 = sadd.s32 1, %s1259_s11  ;;  %s354_s3 = scalar_lea.hbm %s1621_s1, %s898_s28 }
  0x34   : > { %s1477_s7 = scalar_select %p206_p12, %s1259_s11, %s1660_s20  }
  0x35   : > { %s349_s6 = scalar_lea.vmem [#allocation4], %s879_s27  ;;  %s355_s2 = sshll.u32 %s354_s3, 4  ;;  %s356_s2 = int_to_ptr.hbm [resolvable:$true] %s355_s2 }
  0x36   : > { %s357_s4 = sshll.u32 %s349_s6, 4  ;;  %p922_p13 = pnand %p934_p10, %p1460_p5  ;;  %s358_s4 = int_to_ptr.vmem [resolvable:$true] %s357_s4 }
  0x37   : > { %s346_s5 = scalar_lea.sflag [#allocation5], %s345_s8  ;;  %s1661_s26 = smov 8  }
  0x38   : > { %s1662_s21 = smov 128   ;;  %369 = sbr.rel (%p1435_p11) target bundleno = 699 (0x2bb), region = 48 }
  0x39   : > { %924 = dma.hbm_to_vmem [thread:$0]  (!%p922_p13), %s356_s2, 2048, %s358_s4, %s346_s5, %s1662_s21, %s1662_s21, %s1661_s26  }
  0x3a   : > { %s371_s25 = sand.u32 (!%p1435_p11), 1, %s1267_s13  }
  0x3b   : > { %s883_s20 = sshll.u32 (!%p1435_p11), %s371_s25, 7  ;;  %s372_s23 = scalar_lea.sflag (!%p1435_p11), [#allocation5], %s371_s25 }
  0x3c   : > { %s1492_s6 = scalar_lea.vmem (!%p1435_p11), [#allocation4], %s883_s20 }
  0x3d   : > { %1234 = dma.done.wait (%p1416_p3), %s372_s23, 2048  }
  0x3e   : > { %1236 = vsyncadd (%p1416_p3), %s372_s23, 4294965248 }
  0x3f   : > { %1238 = dma.done.wait (%p1407_p1), [#allocation8], 6144  }
  0x40   : > { %1240 = vsyncadd (%p1407_p1), [#allocation8], 4294961152  ;;  %s1503_s2 = sand.u32 1, %s1255_s10   ;;  %p438_p11 = scmp.lt.s32.totalorder %s1279_s16, 1 }
  0x41   : > { %s886_s4 = sshll.u32 %s1503_s2, 3  ;;  %p440_p0 = scmp.lt.s32.totalorder %s1275_s15, 2 }
  0x42   : > { %s439_s12 = scalar_select %p438_p11, %s1279_s16, 1 }
  0x43   : > { %s441_s24 = scalar_select %p440_p0, %s1275_s15, 2 }
  0x44   : > { %s899_s26 = smul.u32 3, %s439_s12  ;;  %s889_s30 = sshll.u32 %s439_s12, 3 }
  0x45   : > { %s1513_s22 = scalar_lea.vmem %s1629_s9, %s889_s30  ;;  %s1518_s20 = scalar_lea.vmem [#allocation10], %s886_s4 }
  0x46   : > { %s443_s28 = sadd.s32 %s899_s26, %s441_s24  ;;  %s1520_s23 = scalar_lea.vmem [#allocation11], %s886_s4 }
  0x47   : > { %s888_s3 = sshll.u32 %s443_s28, 3  ;;  %p890_p1 = scmp.ne.s32.totalorder %s1275_s15, 0 }
  0x48   : > { %s445_s25 = scalar_lea.vmem %s1620_s0, %s888_s3 }
  0x49   : > { %454 = sbr.rel (%p890_p1) target bundleno = 81 (0x51), region = 64 }
  0x4e   : > { %vm456_vm0 = vcmask 7168   ;;  %v1299_v0 = vmov 0.0  }
  0x4f   : > { %455 = vst [vmem:[#allocation2] sm:$0xff] %v1299_v0 }
  0x50   : > { %457 = vst.msk [vmem:[#allocation3] sm:$0xff] %vm456_vm0, %v1299_v0 }
  0x51 PF: > { %v482_v1 = vld [vmem:[%s1492_s6 + $0x78] sm:$0xff]  ;;  %v481_v2 = vld [vmem:[%s1492_s6 + $0x70] sm:$0xff]  ;;  %v480_v3 = vld [vmem:[%s1492_s6 + $0x68] sm:$0xff]  ;;  %vm464_vm1 = vcmask 7168   ;;  %p891_p3 = scmp.ne.s32.totalorder %s1275_s15, 2 }
  0x52   : > { %483 = vmatpush.msra.mxu0 %v482_v1  ;;  %v479_v4 = vld [vmem:[%s1492_s6 + $0x60] sm:$0xff]  ;;  %v458_v5 = vld [vmem:[%s445_s25] sm:$0xff]  ;;  %v478_v6 = vld [vmem:[%s1492_s6 + $0x58] sm:$0xff]  ;;  %s1663_s4 = sld [smem:[#allocation22_spill]] (!%p891_p3) }
  0x53   : > { %v460_v7 = vmul.f32 %v458_v5, %v458_v5  ;;  %v477_v8 = vld [vmem:[%s1492_s6 + $0x50] sm:$0xff]  ;;  %v476_v9 = vld [vmem:[%s1492_s6 + $0x48] sm:$0xff]  ;;  %v475_v10 = vld [vmem:[%s1492_s6 + $0x40] sm:$0xff]  ;;  %s1664_s26 = sld [smem:[#allocation24_spill]] (!%p891_p3) }
  0x54   : > { %484 = vmatpush.msra.mxu0 %v481_v2  ;;  %v474_v11 = vld [vmem:[%s1492_s6 + $0x38] sm:$0xff]  ;;  %v473_v12 = vld [vmem:[%s1492_s6 + $0x30] sm:$0xff]  ;;  %v472_v13 = vld [vmem:[%s1492_s6 + $0x28] sm:$0xff]  ;;  %s1665_s27 = sld [smem:[#allocation26_spill]] (!%p891_p3) }
  0x55   : > { %461 = vadd.xlane.f32.xlu0 %v460_v7  ;;  %v471_v14 = vld [vmem:[%s1492_s6 + $0x20] sm:$0xff]  ;;  %v470_v15 = vld [vmem:[%s1492_s6 + $0x18] sm:$0xff]  ;;  %v469_v16 = vld [vmem:[%s1492_s6 + $0x10] sm:$0xff] }
  0x56   : > { %485 = vmatpush.msra.mxu0 %v480_v3  ;;  %v468_v17 = vld [vmem:[%s1492_s6 + $0x8] sm:$0xff]  ;;  %v467_v18 = vld [vmem:[%s1492_s6] sm:$0xff]  ;;  %v466_v22 = vld [vmem:[#allocation2] sm:$0xff] }
  0x57   : > { %v459_v19 = vld [vmem:[#allocation3] sm:$0xff] }
  0x58   : > { %486 = vmatpush.msra.mxu0 %v479_v4 }
  0x5a   : > { %487 = vmatpush.msra.mxu0 %v478_v6 }
  0x5c   : > { %488 = vmatpush.msra.mxu0 %v477_v8 }
  0x5e   : > { %489 = vmatpush.msra.mxu0 %v476_v9 }
  0x60   : > { %490 = vmatpush.msra.mxu0 %v475_v10 }
  0x62   : > { %491 = vmatpush.msra.mxu0 %v474_v11 }
  0x64   : > { %492 = vmatpush.msra.mxu0 %v473_v12 }
  0x66   : > { %493 = vmatpush.msra.mxu0 %v472_v13 }
  0x68   : > { %494 = vmatpush.msra.mxu0 %v471_v14 }
  0x6a   : > { %495 = vmatpush.msra.mxu0 %v470_v15 }
  0x6c   : > { %496 = vmatpush.msra.mxu0 %v469_v16 }
  0x6e   : > { %497 = vmatpush.msra.mxu0 %v468_v17 }
  0x70   : > { %498 = vmatpush.msra.mxu0 %v467_v18 }
  0x71   : > { %499 = vmatmul.f32.vlgmr.msra.gmra.mxu0 %v458_v5 }
  0xc8   : > { %v462_v20 = vpop.xlane.xlu0 %461 }
  0xc9   : > { %v463_v21 = vadd.f32 %v462_v20, %v459_v19 }
  0xcb   : > { %465 = vst.msk [vmem:[#allocation3] sm:$0xff] %vm464_vm1, %v463_v21 }
  0xed   : > { %508 = sbr.rel (%p891_p3) target bundleno = 659 (0x293), region = 68 }
  0xee   : > { %v500_v23 = vpop.f32.mrf.mxu0 }
  0xef   : > { %v503_v24 = vadd.f32 %v500_v23, %v466_v22 }
  0xf1   : > { %504 = vst [vmem:[#allocation2] sm:$0xff] %v503_v24 }
  0xf2   : > { %v509_v25 = vld [vmem:[#allocation3] sm:$0xff]  ;;  %v564_v26 = vld [vmem:[#allocation7 + $0xf0] sm:$0xff]  ;;  %v1300_v28 = vmov 0   ;;  %v562_v30 = vld [vmem:[#allocation7 + $0xe0] sm:$0xff] }
  0xf3   : > { %v565_v27 = vld [vmem:[#allocation7 + $0xf8] sm:$0xff]  ;;  %1034 = vset.pattern.permute.xlu0 %v1300_v28  ;;  %v510_v29 = vmax.f32 %v509_v25, 1e-24  ;;  %572 = vmatpush.msra.mxu0 %v564_v26  ;;  %v563_v31 = vld [vmem:[#allocation7 + $0xe8] sm:$0xff]  ;;  %v560_v32 = vld [vmem:[#allocation7 + $0xd0] sm:$0xff] }
  0xf4   : > { %592 = vmatpush.msra.mxu1 %v565_v27  ;;  %v561_v33 = vld [vmem:[#allocation7 + $0xd8] sm:$0xff]  ;;  %v558_v34 = vld [vmem:[#allocation7 + $0xc0] sm:$0xff]  ;;  %v559_v35 = vld [vmem:[#allocation7 + $0xc8] sm:$0xff] }
  0xf5   : > { %1037 = vrsqrt.f32 %v510_v29  ;;  %573 = vmatpush.msra.mxu0 %v562_v30  ;;  %v556_v36 = vld [vmem:[#allocation7 + $0xb0] sm:$0xff]  ;;  %v557_v37 = vld [vmem:[#allocation7 + $0xb8] sm:$0xff]  ;;  %v554_v38 = vld [vmem:[#allocation7 + $0xa0] sm:$0xff]  ;;  %vm517_vm2 = vweird.f32 %v510_v29 }
  0xf6   : > { %593 = vmatpush.msra.mxu1 %v563_v31  ;;  %v555_v40 = vld [vmem:[#allocation7 + $0xa8] sm:$0xff]  ;;  %v552_v42 = vld [vmem:[#allocation7 + $0x90] sm:$0xff]  ;;  %v553_v43 = vld [vmem:[#allocation7 + $0x98] sm:$0xff] }
  0xf7   : > { %574 = vmatpush.msra.mxu0 %v560_v32  ;;  %v550_v45 = vld [vmem:[#allocation7 + $0x80] sm:$0xff]  ;;  %v551_v46 = vld [vmem:[#allocation7 + $0x88] sm:$0xff]  ;;  %v548_v48 = vld [vmem:[#allocation7 + $0x70] sm:$0xff] }
  0xf8   : > { %594 = vmatpush.msra.mxu1 %v561_v33  ;;  %v549_v49 = vld [vmem:[#allocation7 + $0x78] sm:$0xff]  ;;  %v546_v51 = vld [vmem:[#allocation7 + $0x60] sm:$0xff]  ;;  %v547_v52 = vld [vmem:[#allocation7 + $0x68] sm:$0xff] }
  0xf9   : > { %575 = vmatpush.msra.mxu0 %v558_v34  ;;  %v544_v55 = vld [vmem:[#allocation7 + $0x50] sm:$0xff]  ;;  %v545_v56 = vld [vmem:[#allocation7 + $0x58] sm:$0xff]  ;;  %v542_v57 = vld [vmem:[#allocation7 + $0x40] sm:$0xff] }
  0xfa   : > { %595 = vmatpush.msra.mxu1 %v559_v35  ;;  %v543_v58 = vld [vmem:[#allocation7 + $0x48] sm:$0xff]  ;;  %v540_v59 = vld [vmem:[#allocation7 + $0x30] sm:$0xff]  ;;  %v541_v60 = vld [vmem:[#allocation7 + $0x38] sm:$0xff] }
  0xfb   : > { %v1038_v39 = vpop.eup %1037  ;;  %576 = vmatpush.msra.mxu0 %v556_v36  ;;  %v538_v61 = vld [vmem:[#allocation7 + $0x20] sm:$0xff]  ;;  %v539_v62 = vld [vmem:[#allocation7 + $0x28] sm:$0xff]  ;;  %v536_v63 = vld [vmem:[#allocation7 + $0x10] sm:$0xff] }
  0xfc   : > { %v512_v41 = vmul.f32 %v1038_v39, %v510_v29  ;;  %596 = vmatpush.msra.mxu1 %v557_v37  ;;  %vm518_vm3 = vweird.f32 %v1038_v39  ;;  %v537_v0 = vld [vmem:[#allocation7 + $0x18] sm:$0xff]  ;;  %v534_v1 = vld [vmem:[#allocation7] sm:$0xff]  ;;  %v535_v2 = vld [vmem:[#allocation7 + $0x8] sm:$0xff] }
  0xfd   : > { %577 = vmatpush.msra.mxu0 %v554_v38  ;;  %vm519_vm4 = vmor %vm517_vm2, %vm518_vm3  ;;  %v629_v3 = vld [vmem:[#allocation9 + $0x78] sm:$0xff]  ;;  %v628_v4 = vld [vmem:[#allocation9 + $0x70] sm:$0xff] }
  0xfe   : > { %v513_v44 = vmul.f32 %v1038_v39, %v512_v41  ;;  %597 = vmatpush.msra.mxu1 %v555_v40  ;;  %634 = vmatpush.msra.mxu2 %v629_v3  ;;  %v627_v5 = vld [vmem:[#allocation9 + $0x68] sm:$0xff]  ;;  %v626_v6 = vld [vmem:[#allocation9 + $0x60] sm:$0xff]  ;;  %v625_v7 = vld [vmem:[#allocation9 + $0x58] sm:$0xff] }
  0xff   : > { %578 = vmatpush.msra.mxu0 %v552_v42  ;;  %v624_v8 = vld [vmem:[#allocation9 + $0x50] sm:$0xff]  ;;  %v623_v9 = vld [vmem:[#allocation9 + $0x48] sm:$0xff]  ;;  %v622_v10 = vld [vmem:[#allocation9 + $0x40] sm:$0xff] }
 0x100   : > { %v514_v47 = vmul.f32 0.5, %v513_v44  ;;  %598 = vmatpush.msra.mxu1 %v553_v43  ;;  %635 = vmatpush.msra.mxu2 %v628_v4  ;;  %v621_v11 = vld [vmem:[#allocation9 + $0x38] sm:$0xff]  ;;  %v620_v12 = vld [vmem:[#allocation9 + $0x30] sm:$0xff]  ;;  %v619_v14 = vld [vmem:[#allocation9 + $0x28] sm:$0xff] }
 0x101   : > { %579 = vmatpush.msra.mxu0 %v550_v45  ;;  %v521_v13 = vld [vmem:[#allocation2] sm:$0xff]  ;;  %v618_v17 = vld [vmem:[#allocation9 + $0x20] sm:$0xff]  ;;  %v617_v19 = vld [vmem:[#allocation9 + $0x18] sm:$0xff] }
 0x102   : > { %v515_v50 = vsub.f32 1.5, %v514_v47  ;;  %599 = vmatpush.msra.mxu1 %v551_v46  ;;  %636 = vmatpush.msra.mxu2 %v627_v5  ;;  %v1035_v15 = vld [vmem:[%s1663_s4] ss:$0 sm:$0xff]  ;;  %v615_v23 = vld [vmem:[#allocation9 + $0x8] sm:$0xff]  ;;  %v614_v24 = vld [vmem:[#allocation9] sm:$0xff] }
 0x103   : > { %580 = vmatpush.msra.mxu0 %v548_v48  ;;  %v616_v21 = vld [vmem:[#allocation9 + $0x10] sm:$0xff] }
 0x104   : > { %v516_v53 = vmul.f32 %v1038_v39, %v515_v50  ;;  %600 = vmatpush.msra.mxu1 %v549_v49  ;;  %637 = vmatpush.msra.mxu2 %v626_v6  ;;  %v566_v25 = vld [vmem:[%s1664_s26] sm:$0x3] }
 0x105   : > { %581 = vmatpush.msra.mxu0 %v546_v51  ;;  %v568_v26 = vperm.slane %v566_v25, 0  ;;  %v569_v27 = vperm.slane %v566_v25, 1  ;;  %v1036_v32 = vld [vmem:[%s1665_s27] ss:$0 sm:$0xff] }
 0x106   : > { %v520_v54 = vsel %vm519_vm4, %v1038_v39, %v516_v53  ;;  %601 = vmatpush.msra.mxu1 %v547_v52  ;;  %638 = vmatpush.msra.mxu2 %v625_v7 }
 0x107   : > { %524 = vperm.xlu0 %1034, %v520_v54   ;;  %582 = vmatpush.msra.mxu0 %v544_v55 }
 0x108   : > { %602 = vmatpush.msra.mxu1 %v545_v56  ;;  %639 = vmatpush.msra.mxu2 %v624_v8 }
 0x109   : > { %583 = vmatpush.msra.mxu0 %v542_v57 }
 0x10a   : > { %603 = vmatpush.msra.mxu1 %v543_v58  ;;  %640 = vmatpush.msra.mxu2 %v623_v9 }
 0x10b   : > { %584 = vmatpush.msra.mxu0 %v540_v59 }
 0x10c   : > { %604 = vmatpush.msra.mxu1 %v541_v60  ;;  %641 = vmatpush.msra.mxu2 %v622_v10 }
 0x10d   : > { %585 = vmatpush.msra.mxu0 %v538_v61 }
 0x10e   : > { %605 = vmatpush.msra.mxu1 %v539_v62  ;;  %642 = vmatpush.msra.mxu2 %v621_v11 }
 0x10f   : > { %586 = vmatpush.msra.mxu0 %v536_v63 }
 0x110   : > { %606 = vmatpush.msra.mxu1 %v537_v0  ;;  %643 = vmatpush.msra.mxu2 %v620_v12 }
 0x111   : > { %587 = vmatpush.msra.mxu0 %v534_v1 }
 0x112   : > { %607 = vmatpush.msra.mxu1 %v535_v2  ;;  %644 = vmatpush.msra.mxu2 %v619_v14 }
 0x114   : > { %645 = vmatpush.msra.mxu2 %v618_v17 }
 0x116   : > { %646 = vmatpush.msra.mxu2 %v617_v19 }
 0x118   : > { %647 = vmatpush.msra.mxu2 %v616_v21 }
 0x11a   : > { %648 = vmatpush.msra.mxu2 %v615_v23 }
 0x11c   : > { %649 = vmatpush.msra.mxu2 %v614_v24 }
 0x179   : > { %v525_v16 = vpop.permute.xlu0 %524 }
 0x17a   : > { %v527_v18 = vmul.f32 %v525_v16, %v521_v13 }
 0x17c   : > { %v532_v20 = vadd.f32 %v1035_v15, %v527_v18 }
 0x17e   : > { %1039 = vtanh.f32 %v532_v20 }
 0x184   : > { %v1040_v22 = vpop.eup %1039 }
 0x185   : > { %588 = vmatmul.f32.vlgmr.msra.gmra.mxu0 %v1040_v22  ;;  %608 = vmatmul.f32.vlgmr.msra.gmra.mxu1 %v1040_v22 }
 0x202   : > { %v589_v28 = vpop.f32.mrf.mxu0  ;;  %v609_v29 = vpop.f32.mrf.mxu1 }
 0x203   : > { %v590_v30 = vadd.f32 %v589_v28, %v568_v26  ;;  %v610_v31 = vadd.f32 %v609_v29, %v569_v27 }
 0x205   : > { %612 = vst [vmem:[%s1518_s20] sm:$0xff] %v590_v30  ;;  %650 = vmatmul.f32.vlgmr.msra.gmra.mxu2 %v590_v30 }
 0x206   : > { %613 = vst [vmem:[%s1520_s23] sm:$0xff] %v610_v31 }
 0x288   : > { %v651_v33 = vpop.f32.mrf.mxu2 }
 0x289   : > { %v652_v34 = vadd.f32 %v1036_v32, %v651_v33 }
 0x28b   : > { %1041 = vtanh.f32 %v652_v34 }
 0x291   : > { %v1042_v35 = vpop.eup %1041 }
 0x292   : > { %655 = vst [vmem:[%s1513_s22] sm:$0xff] %v1042_v35 }
 0x293 PF: > { %s894_s3 = sshll.u32 %s1279_s16, 3  ;;  %s1667_s25 = sld [smem:[#allocation27_spill]] }
 0x294   : > { %s678_s6 = sshll.u32 %s1518_s20, 4  ;;  %s657_s12 = scalar_lea.sflag [#allocation6], %s1503_s2  ;;  %s679_s6 = int_to_ptr.vmem [resolvable:$true] %s678_s6 }
 0x299   : > { %s676_s15 = scalar_lea.hbm %s1667_s25, %s894_s3  ;;  %s1153_s16 = scalar_lea.hbm %s1667_s25, 16 }
 0x29a   : > { %s680_s4 = sshll.u32 %s676_s15, 4  ;;  %s681_s4 = int_to_ptr.hbm [resolvable:$true] %s680_s4 }
 0x29b   : > { %s1147_s24 = sshra.s32 %s681_s4, 4  ;;  %s1148_s24 = int_to_ptr.hbm [resolvable:$true] %s1147_s24 }
 0x29c   : > { %s1149_s26 = scalar_lea.hbm %s1148_s24, 8  ;;  %p1154_p6 = scmp.lt.s32.totalorder %s1148_s24, %s1667_s25 }
 0x29d   : > { %p1150_p2 = scmp.ne.s32.totalorder %s1148_s24, %s1149_s26  ;;  %p1155_p8 = scmp.lt.s32.totalorder %s1153_s16, %s1149_s26 }
 0x29f   : > { %p1151_p4 = pnand %p1150_p2, %p1422_p7  ;;  %p1156_p10 = por %p1155_p8, %p1154_p6 }
 0x2a1   : > { %p1152_p5 = pneg %p1151_p4 }
 0x2a3   : > { %p1157_p12 = pnand %p1156_p10, %p1152_p5 }
 0x2a5   : > { %1160 = shalt.err (!%p1157_p12)
}
 0x2a6   : > { %910 = dma.vmem_to_hbm [thread:$0]  (%p1422_p7), %s679_s6, 128, %s681_s4, %s657_s12  }
 0x2a7   : > { %s1668_s21 = sld [smem:[#allocation28_spill]]  ;;  %s692_s22 = sshll.u32 %s1520_s23, 4  ;;  %s693_s22 = int_to_ptr.vmem [resolvable:$true] %s692_s22 }
 0x2a8   : > { %s662_s8 = scalar_lea.sflag [#allocation12], %s1503_s2 }
 0x2ad   : > { %s690_s15 = scalar_lea.hbm %s1668_s21, %s894_s3  ;;  %s1181_s6 = scalar_lea.hbm %s1668_s21, 16 }
 0x2ae   : > { %s694_s30 = sshll.u32 %s690_s15, 4  ;;  %s695_s30 = int_to_ptr.hbm [resolvable:$true] %s694_s30 }
 0x2af   : > { %s1175_s24 = sshra.s32 %s695_s30, 4  ;;  %s1176_s24 = int_to_ptr.hbm [resolvable:$true] %s1175_s24 }
 0x2b0   : > { %s1177_s26 = scalar_lea.hbm %s1176_s24, 8  ;;  %p1182_p1 = scmp.lt.s32.totalorder %s1176_s24, %s1668_s21 }
 0x2b1   : > { %p1178_p13 = scmp.ne.s32.totalorder %s1176_s24, %s1177_s26  ;;  %p1183_p3 = scmp.lt.s32.totalorder %s1181_s6, %s1177_s26 }
 0x2b3   : > { %p1179_p11 = pnand %p1178_p13, %p1422_p7  ;;  %p1184_p2 = por %p1183_p3, %p1182_p1 }
 0x2b5   : > { %p1180_p0 = pneg %p1179_p11 }
 0x2b7   : > { %p1185_p4 = pnand %p1184_p2, %p1180_p0 }
 0x2b9   : > { %1188 = shalt.err (!%p1185_p4)
}
 0x2ba   : > { %911 = dma.vmem_to_hbm [thread:$0]  (%p1422_p7), %s693_s22, 128, %s695_s30, %s662_s8  }
 0x2bb PF: > { %s1669_s2 = sld [smem:[#allocation17_spill]]  ;;  %p937_p5 = scmp.ge.s32.totalorder %s1291_s19, 2 }
 0x2bd   : > { %p926_p6 = pnand %p937_p5, %p1427_p9 }
 0x2bf   : > { %p927_p8 = pneg %p926_p6 }
 0x2c1   : > { %s709_s3 = sand.u32 1, %s1669_s2  }
 0x2c2   : > { %s710_s20 = scalar_lea.sflag [#allocation6], %s709_s3 }
 0x2c3   : > { %1242 = dma.done.wait (%p927_p8), %s710_s20, 128  }
 0x2c4   : > { %1244 = vsyncadd (%p927_p8), %s710_s20, 4294967168  ;;  %s720_s5 = scalar_lea.sflag [#allocation12], %s709_s3 }
 0x2c5   : > { %1246 = dma.done.wait (%p927_p8), %s720_s5, 128  }
 0x2c6   : > { %1248 = vsyncadd (%p927_p8), %s720_s5, 4294967168  ;;  %s30_s19 = sadd.s32 1, %s1291_s19   ;;  %s1671_s28 = sld [smem:[#allocation20_spill]] }
 0x2c7   : > { %p27_p10 = scmp.ge.s32.totalorder %s30_s19, 8   ;;  %s1672_s22 = sld [smem:[#allocation21_spill]] }
 0x2c8   : > { %s1673_s30 = smov %s1255_s10  ;;  %s1674_s10 = smov %s1259_s11 }
 0x2c9   : > { %s1675_s11 = smov %s1477_s7  ;;  %s1676_s12 = smov %s1267_s13 }
 0x2ca   : > { %s1677_s13 = smov %s1271_s14  ;;  %s1678_s14 = smov %s1469_s29 }
 0x2cb   : > { %s1679_s15 = smov %s1283_s17  ;;  %s1680_s16 = smov %s1287_s18 }
 0x2cc   : > { %s1681_s17 = smov %s1671_s28  ;;  %29 = sbr.rel (!%p27_p10) target bundleno = 20 (0x14), region = 141 }
 0x2cd   : > { %s1682_s18 = smov %s1672_s22 }
 0x2d1   :  { %733 = vsyncpa [#allocation5], 1 }
 0x2d2   :  { %735 = vsyncpa [#allocation5 + $0x1], 1 }
 0x2d3   :  { %736 = vsyncpa [#allocation8], 1 }
 0x2d4   :  { %737 = vsyncpa [#allocation6], 1 }
 0x2d5   :  { %739 = vsyncpa [#allocation6 + $0x1], 1 }
 0x2d6   :  { %740 = vsyncpa [#allocation12], 1 }
 0x2d7   :  { %742 = vsyncpa [#allocation12 + $0x1], 1 }

</bundles_post_ra>
